<compile_context>
chip_gen: v5e
topology: v5e:2x2
jax: 0.10.0
libtpu: 0.0.40
codegen_flags: <defaults>
</compile_context>

<pallas_src>
import math

import jax
import jax.numpy as jnp
from jax.experimental import pallas as pl
from jax.experimental.pallas import tpu as pltpu

EPSILON = 1e-6
LOG_EPSILON = math.log(EPSILON)

LANE = 128      # vreg lane width
SUBLANE = 8     # f32 sublane count


def _round_up(x, m):
    return ((x + m - 1) // m) * m


def _policy_kernel(x_ref, w1_ref, b1_ref, w2_ref, b2_ref, w3_ref, b3_ref,
                   sigma_ref, noise_ref, act_ref):
    """One (TB, *) batch tile: action = MLP(state) + exp(clamp(sigma)) * eps."""
    # MXU runs in bf16 with f32 accumulation; weights are stored bf16.
    x = x_ref[...].astype(jnp.bfloat16)

    h1 = jnp.dot(x, w1_ref[...], preferred_element_type=jnp.float32) + b1_ref[...]
    h1 = jnp.maximum(h1, 0.0).astype(jnp.bfloat16)

    h2 = jnp.dot(h1, w2_ref[...], preferred_element_type=jnp.float32) + b2_ref[...]
    h2 = jnp.maximum(h2, 0.0).astype(jnp.bfloat16)

    loc = jnp.dot(h2, w3_ref[...], preferred_element_type=jnp.float32) + b3_ref[...]

    # scale is a per-output-dim constant. The exp lands on the EUP slot (free
    # under the MXU work), so recomputing it per tile is cheaper and safer
    # than a pl.when(pid==0) scratch hand-off under "parallel" grid semantics
    # (each TensorCore owns its own scratch and only one would see pid 0).
    scale = jnp.exp(jnp.maximum(sigma_ref[...], LOG_EPSILON))

    # Lane-dense (TB, 128k) store: unmasked vst, no partial-vreg padding waste.
    act_ref[...] = loc + scale * noise_ref[...]


def diag_normal_policy_forward(state, params, noise, *, block_batch=256):
    """Batch-tiled pallas_call. state: (B, in) f32, noise: (B, out) f32."""
    w1, b1, w2, b2, w3, b3, sigma = params
    batch, d_in = state.shape
    h1 = w1.shape[1]
    h2 = w2.shape[1]
    d_out = w3.shape[1]

    # --- lane-dense padding of every feature axis ---------------------------
    d_in_p = _round_up(d_in, LANE)
    h1_p = _round_up(h1, LANE)
    h2_p = _round_up(h2, LANE)
    d_out_p = _round_up(d_out, LANE)

    # --- batch tiling --------------------------------------------------------
    tb = min(block_batch, _round_up(batch, SUBLANE))
    tb = _round_up(tb, SUBLANE)
    batch_p = _round_up(batch, tb)
    grid = (batch_p // tb,)

    def pad2(a, rows, cols):
        return jnp.pad(a, ((0, rows - a.shape[0]), (0, cols - a.shape[1])))

    state_p = pad2(state.astype(jnp.float32), batch_p, d_in_p)
    noise_p = pad2(noise.astype(jnp.float32), batch_p, d_out_p)
    w1_p = pad2(w1, d_in_p, h1_p)
    w2_p = pad2(w2, h1_p, h2_p)
    w3_p = pad2(w3, h2_p, d_out_p)
    b1_p = pad2(b1, 1, h1_p)
    b2_p = pad2(b2, 1, h2_p)
    b3_p = pad2(b3, 1, d_out_p)
    # Padded sigma lanes are 0 -> scale 1; their noise lanes are 0, and the
    # padded action lanes are sliced off below, so padding is inert.
    sigma_p = pad2(sigma, 1, d_out_p)

    # --- specs ---------------------------------------------------------------
    x_spec = pl.BlockSpec((tb, d_in_p), lambda i: (i, 0))
    n_spec = pl.BlockSpec((tb, d_out_p), lambda i: (i, 0))
    o_spec = pl.BlockSpec((tb, d_out_p), lambda i: (i, 0))

    def resident(shape):  # weights / biases / sigma stay pinned in VMEM
        return pl.BlockSpec(shape, lambda i: (0, 0))

    in_specs = [
        x_spec,
        resident((d_in_p, h1_p)), resident((1, h1_p)),
        resident((h1_p, h2_p)), resident((1, h2_p)),
        resident((h2_p, d_out_p)), resident((1, d_out_p)),
        resident((1, d_out_p)),
        n_spec,
    ]

    # --- VMEM budget (sized against v7x's 64 MiB per-TC VMEM) ---------------
    stream_bytes = 2 * tb * (d_in_p + 2 * d_out_p) * 4          # double-buffered tiles
    weight_bytes = 2 * (d_in_p * h1_p + h1_p * h2_p + h2_p * d_out_p)   # bf16
    misc_bytes = 4 * (h1_p + h2_p + 2 * d_out_p)
    vmem_limit = min(64 << 20,
                     max(16 << 20, 2 * (stream_bytes + weight_bytes + misc_bytes)
                         + (4 << 20)))

    flops = 2 * batch_p * (d_in_p * h1_p + h1_p * h2_p + h2_p * d_out_p)
    bytes_accessed = (batch_p * d_in_p * 4          # state in
                      + 2 * batch_p * d_out_p * 4   # noise in + action out
                      + weight_bytes + misc_bytes)
    cost = pl.CostEstimate(flops=flops,
                           transcendentals=grid[0] * d_out_p,
                           bytes_accessed=bytes_accessed)

    out_p = pl.pallas_call(
        _policy_kernel,
        out_shape=jax.ShapeDtypeStruct((batch_p, d_out_p), jnp.float32),
        grid_spec=pltpu.PrefetchScalarGridSpec(
            num_scalar_prefetch=0,
            grid=grid,
            in_specs=in_specs,
            out_specs=o_spec,
        ),
        compiler_params=pltpu.CompilerParams(
            dimension_semantics=("parallel",),   # batch tiles split across TCs (v7x)
            vmem_limit_bytes=vmem_limit,
        ),
        cost_estimate=cost,
    )(state_p, w1_p, b1_p, w2_p, b2_p, w3_p, b3_p, sigma_p, noise_p)

    return out_p[:batch, :d_out]


# ----------------------------- init & reference ------------------------------

def xavier_uniform(key, fan_in, fan_out):
    """nn.init.xavier_uniform_: U(-a, a), a = sqrt(6 / (fan_in + fan_out))."""
    bound = math.sqrt(6.0 / (fan_in + fan_out))
    # Stored as (in, out): transposed vs. PyTorch's (out, in) Linear weight,
    # so the kernel computes x @ W + b == x @ W_pt.T + b.
    return jax.random.uniform(key, (fan_in, fan_out), jnp.float32,
                              minval=-bound, maxval=bound)


def init_params(key, input_size, hiddens, output_size):
    k1, k2, k3 = jax.random.split(key, 3)
    w1 = xavier_uniform(k1, input_size, hiddens[0]).astype(jnp.bfloat16)
    b1 = jnp.zeros((1, hiddens[0]), jnp.float32)
    w2 = xavier_uniform(k2, hiddens[0], hiddens[1]).astype(jnp.bfloat16)
    b2 = jnp.zeros((1, hiddens[1]), jnp.float32)
    w3 = xavier_uniform(k3, hiddens[1], output_size).astype(jnp.bfloat16)
    b3 = jnp.zeros((1, output_size), jnp.float32)
    sigma = jnp.full((1, output_size), math.log(1.0), jnp.float32)  # sigma.fill_(log(1))
    return (w1, b1, w2, b2, w3, b3, sigma)


def reference_forward(state, params, noise):
    """Pure-JAX reference with the same bf16-weight / f32-accum math."""
    w1, b1, w2, b2, w3, b3, sigma = params

    def dot(a, w):
        return jnp.dot(a.astype(jnp.bfloat16), w,
                       preferred_element_type=jnp.float32)

    h1 = jnp.maximum(dot(state, w1) + b1, 0.0)
    h2 = jnp.maximum(dot(h1, w2) + b2, 0.0)
    loc = dot(h2, w3) + b3
    scale = jnp.exp(jnp.maximum(sigma, LOG_EPSILON))
    return loc + scale * noise


if __name__ == "__main__":
    # Small shapes consistent with the module's forward:
    # state: (batch, input_size); hiddens kept small for a test-sized kernel.
    batch, input_size, output_size = 8, 16, 8
    hiddens = [32, 32]

    key = jax.random.PRNGKey(0)
    k_params, k_state, k_noise = jax.random.split(key, 3)

    params = init_params(k_params, input_size, hiddens, output_size)
    state = jax.random.normal(k_state, (batch, input_size), jnp.float32)
    # eps ~ N(0,1) for the reparameterized Normal(loc, scale).sample()
    noise = jax.random.normal(k_noise, (batch, output_size), jnp.float32)

    action = diag_normal_policy_forward(state, params, noise)
    action = jax.block_until_ready(action)

    expected = reference_forward(state, params, noise)
    assert action.shape == (batch, output_size)
    assert jnp.allclose(action, expected, atol=1e-4, rtol=1e-4), (
        jnp.max(jnp.abs(action - expected)))

    print("KERNEL_OK")
</pallas_src>

<mosaic_0001>
module attributes {stable_mosaic.version = 11 : i64} {
  func.func @_policy_kernel(%arg0: i32, %arg1: memref<8x128xf32, #tpu.memory_space<vmem>>, %arg2: memref<128x128xbf16, #tpu.memory_space<vmem>>, %arg3: memref<1x128xf32, #tpu.memory_space<vmem>>, %arg4: memref<128x128xbf16, #tpu.memory_space<vmem>>, %arg5: memref<1x128xf32, #tpu.memory_space<vmem>>, %arg6: memref<128x128xbf16, #tpu.memory_space<vmem>>, %arg7: memref<1x128xf32, #tpu.memory_space<vmem>>, %arg8: memref<1x128xf32, #tpu.memory_space<vmem>>, %arg9: memref<8x128xf32, #tpu.memory_space<vmem>>, %arg10: memref<8x128xf32, #tpu.memory_space<vmem>>) attributes {dimension_semantics = [#tpu.dimension_semantics<parallel>], iteration_bounds = array<i64: 1>, scalar_prefetch = 0 : i64, scratch_operands = 0 : i64, tpu.core_type = #tpu.core_type<tc>, window_params = [{transform_indices = @transform_0, window_bounds = array<i64: 8, 128>}, {pipeline_mode = #tpu.pipeline_mode<synchronous>, transform_indices = @transform_1, window_bounds = array<i64: 128, 128>}, {pipeline_mode = #tpu.pipeline_mode<synchronous>, transform_indices = @transform_2, window_bounds = array<i64: 1, 128>}, {pipeline_mode = #tpu.pipeline_mode<synchronous>, transform_indices = @transform_3, window_bounds = array<i64: 128, 128>}, {pipeline_mode = #tpu.pipeline_mode<synchronous>, transform_indices = @transform_4, window_bounds = array<i64: 1, 128>}, {pipeline_mode = #tpu.pipeline_mode<synchronous>, transform_indices = @transform_5, window_bounds = array<i64: 128, 128>}, {pipeline_mode = #tpu.pipeline_mode<synchronous>, transform_indices = @transform_6, window_bounds = array<i64: 1, 128>}, {pipeline_mode = #tpu.pipeline_mode<synchronous>, transform_indices = @transform_7, window_bounds = array<i64: 1, 128>}, {transform_indices = @transform_8, window_bounds = array<i64: 8, 128>}, {transform_indices = @transform_9, window_bounds = array<i64: 8, 128>}]} {
    %c0 = arith.constant 0 : index
    %c0_0 = arith.constant 0 : index
    %0 = vector.load %arg1[%c0, %c0_0] : memref<8x128xf32, #tpu.memory_space<vmem>>, vector<8x128xf32>
    %1 = arith.truncf %0 : vector<8x128xf32> to vector<8x128xbf16>
    %c0_1 = arith.constant 0 : index
    %c0_2 = arith.constant 0 : index
    %2 = vector.load %arg2[%c0_1, %c0_2] : memref<128x128xbf16, #tpu.memory_space<vmem>>, vector<128x128xbf16>
    %cst = arith.constant dense<0.000000e+00> : vector<8x128xf32>
    %3 = tpu.matmul %1, %2, %cst {dimension_numbers = #tpu.dot_dimension_numbers<[1], [0], [0], [1], [0, 0, 1, 1], [], []>} : vector<8x128xbf16>, vector<128x128xbf16>, vector<8x128xf32> -> vector<8x128xf32>
    %c0_3 = arith.constant 0 : index
    %c0_4 = arith.constant 0 : index
    %4 = vector.load %arg3[%c0_3, %c0_4] : memref<1x128xf32, #tpu.memory_space<vmem>>, vector<1x128xf32>
    %5 = vector.broadcast %4 : vector<1x128xf32> to vector<8x128xf32>
    %6 = arith.addf %3, %5 : vector<8x128xf32>
    %cst_5 = arith.constant 0.000000e+00 : f32
    %7 = vector.broadcast %cst_5 : f32 to vector<8x128xf32>
    %8 = arith.maximumf %6, %7 : vector<8x128xf32>
    %9 = arith.truncf %8 : vector<8x128xf32> to vector<8x128xbf16>
    %c0_6 = arith.constant 0 : index
    %c0_7 = arith.constant 0 : index
    %10 = vector.load %arg4[%c0_6, %c0_7] : memref<128x128xbf16, #tpu.memory_space<vmem>>, vector<128x128xbf16>
    %cst_8 = arith.constant dense<0.000000e+00> : vector<8x128xf32>
    %11 = tpu.matmul %9, %10, %cst_8 {dimension_numbers = #tpu.dot_dimension_numbers<[1], [0], [0], [1], [0, 0, 1, 1], [], []>} : vector<8x128xbf16>, vector<128x128xbf16>, vector<8x128xf32> -> vector<8x128xf32>
    %c0_9 = arith.constant 0 : index
    %c0_10 = arith.constant 0 : index
    %12 = vector.load %arg5[%c0_9, %c0_10] : memref<1x128xf32, #tpu.memory_space<vmem>>, vector<1x128xf32>
    %13 = vector.broadcast %12 : vector<1x128xf32> to vector<8x128xf32>
    %14 = arith.addf %11, %13 : vector<8x128xf32>
    %cst_11 = arith.constant 0.000000e+00 : f32
    %15 = vector.broadcast %cst_11 : f32 to vector<8x128xf32>
    %16 = arith.maximumf %14, %15 : vector<8x128xf32>
    %17 = arith.truncf %16 : vector<8x128xf32> to vector<8x128xbf16>
    %c0_12 = arith.constant 0 : index
    %c0_13 = arith.constant 0 : index
    %18 = vector.load %arg6[%c0_12, %c0_13] : memref<128x128xbf16, #tpu.memory_space<vmem>>, vector<128x128xbf16>
    %cst_14 = arith.constant dense<0.000000e+00> : vector<8x128xf32>
    %19 = tpu.matmul %17, %18, %cst_14 {dimension_numbers = #tpu.dot_dimension_numbers<[1], [0], [0], [1], [0, 0, 1, 1], [], []>} : vector<8x128xbf16>, vector<128x128xbf16>, vector<8x128xf32> -> vector<8x128xf32>
    %c0_15 = arith.constant 0 : index
    %c0_16 = arith.constant 0 : index
    %20 = vector.load %arg7[%c0_15, %c0_16] : memref<1x128xf32, #tpu.memory_space<vmem>>, vector<1x128xf32>
    %21 = vector.broadcast %20 : vector<1x128xf32> to vector<8x128xf32>
    %22 = arith.addf %19, %21 : vector<8x128xf32>
    %c0_17 = arith.constant 0 : index
    %c0_18 = arith.constant 0 : index
    %23 = vector.load %arg8[%c0_17, %c0_18] : memref<1x128xf32, #tpu.memory_space<vmem>>, vector<1x128xf32>
    %cst_19 = arith.constant -13.8155107 : f32
    %24 = vector.broadcast %cst_19 : f32 to vector<1x128xf32>
    %25 = arith.maximumf %23, %24 : vector<1x128xf32>
    %26 = math.exp %25 : vector<1x128xf32>
    %c0_20 = arith.constant 0 : index
    %c0_21 = arith.constant 0 : index
    %27 = vector.load %arg9[%c0_20, %c0_21] : memref<8x128xf32, #tpu.memory_space<vmem>>, vector<8x128xf32>
    %28 = vector.broadcast %26 : vector<1x128xf32> to vector<8x128xf32>
    %29 = arith.mulf %28, %27 : vector<8x128xf32>
    %30 = arith.addf %22, %29 : vector<8x128xf32>
    %c0_22 = arith.constant 0 : index
    %c0_23 = arith.constant 0 : index
    %31 = vector.load %arg10[%c0_22, %c0_23] : memref<8x128xf32, #tpu.memory_space<vmem>>, vector<8x128xf32>
    tpu.vector_store %arg10[%c0_22, %c0_23], %30 {strides = array<i32>} : memref<8x128xf32, #tpu.memory_space<vmem>>, vector<8x128xf32>,
    return
  }
  func.func @transform_0(%arg0: i32) -> (i32, i32) {
    %c0_i32 = arith.constant 0 : i32
    %c0_i32_0 = arith.constant 0 : i32
    return %arg0, %c0_i32 : i32, i32
  }
  func.func @transform_1(%arg0: i32) -> (i32, i32) {
    %c0_i32 = arith.constant 0 : i32
    %c0_i32_0 = arith.constant 0 : i32
    %c0_i32_1 = arith.constant 0 : i32
    return %c0_i32, %c0_i32_0 : i32, i32
  }
  func.func @transform_2(%arg0: i32) -> (i32, i32) {
    %c0_i32 = arith.constant 0 : i32
    %c0_i32_0 = arith.constant 0 : i32
    %c0_i32_1 = arith.constant 0 : i32
    return %c0_i32, %c0_i32_0 : i32, i32
  }
  func.func @transform_3(%arg0: i32) -> (i32, i32) {
    %c0_i32 = arith.constant 0 : i32
    %c0_i32_0 = arith.constant 0 : i32
    %c0_i32_1 = arith.constant 0 : i32
    return %c0_i32, %c0_i32_0 : i32, i32
  }
  func.func @transform_4(%arg0: i32) -> (i32, i32) {
    %c0_i32 = arith.constant 0 : i32
    %c0_i32_0 = arith.constant 0 : i32
    %c0_i32_1 = arith.constant 0 : i32
    return %c0_i32, %c0_i32_0 : i32, i32
  }
  func.func @transform_5(%arg0: i32) -> (i32, i32) {
    %c0_i32 = arith.constant 0 : i32
    %c0_i32_0 = arith.constant 0 : i32
    %c0_i32_1 = arith.constant 0 : i32
    return %c0_i32, %c0_i32_0 : i32, i32
  }
  func.func @transform_6(%arg0: i32) -> (i32, i32) {
    %c0_i32 = arith.constant 0 : i32
    %c0_i32_0 = arith.constant 0 : i32
    %c0_i32_1 = arith.constant 0 : i32
    return %c0_i32, %c0_i32_0 : i32, i32
  }
  func.func @transform_7(%arg0: i32) -> (i32, i32) {
    %c0_i32 = arith.constant 0 : i32
    %c0_i32_0 = arith.constant 0 : i32
    %c0_i32_1 = arith.constant 0 : i32
    return %c0_i32, %c0_i32_0 : i32, i32
  }
  func.func @transform_8(%arg0: i32) -> (i32, i32) {
    %c0_i32 = arith.constant 0 : i32
    %c0_i32_0 = arith.constant 0 : i32
    return %arg0, %c0_i32 : i32, i32
  }
  func.func @transform_9(%arg0: i32) -> (i32, i32) {
    %c0_i32 = arith.constant 0 : i32
    %c0_i32_0 = arith.constant 0 : i32
    return %arg0, %c0_i32 : i32, i32
  }
}

</mosaic_0001>

<bundles_post_ra>
// kernel: tpu_custom_call.1
= control target key start
LH: loop header
LB: loop body
LE: loop exit
PB: predicated region body
PF: predicated region fallthrough
CT: control target
= control target key end

     0   :  { %14 = vsyncpa [#allocation3], 0  ;;  %s759_s0 = inlined_call_operand.hbm [shape: f32[8,128], index: 0, kind: input, shape index: {}]   ;;  %s760_s1 = inlined_call_operand.hbm [shape: bf16[128,128], index: 1, kind: input, shape index: {}]   ;;  %s761_s2 = inlined_call_operand.vmem [shape: f32[1,128], index: 2, kind: input, shape index: {}]   ;;  %s762_s3 = inlined_call_operand.hbm [shape: bf16[128,128], index: 3, kind: input, shape index: {}]   ;;  %s763_s4 = inlined_call_operand.vmem [shape: f32[1,128], index: 4, kind: input, shape index: {}]   ;;  %s764_s5 = inlined_call_operand.hbm [shape: bf16[128,128], index: 5, kind: input, shape index: {}]   ;;  %s765_s6 = inlined_call_operand.vmem [shape: f32[1,128], index: 6, kind: input, shape index: {}]   ;;  %s766_s7 = inlined_call_operand.vmem [shape: f32[1,128], index: 7, kind: input, shape index: {}]   ;;  %s767_s8 = inlined_call_operand.hbm [shape: f32[8,128], index: 8, kind: input, shape index: {}]   ;;  %s768_s9 = inlined_call_operand.hbm [shape: f32[8,128], index: 9, kind: output, shape index: {}]  }
   0x1   :  { %15 = vsyncpa [#allocation6], 0 }
   0x2   :  { %16 = vsyncpa [#allocation9], 0  ;;  %s33_s11 = sshll.u32 %s760_s1, 4  ;;  %s34_s11 = int_to_ptr.hbm [resolvable:$true] %s33_s11 }
   0x3   :  { %17 = vsyncpa [#allocation4], 0  ;;  %s671_s12 = smov [#allocation5]   ;;  %s63_s16 = sshll.u32 %s764_s5, 4  ;;  %s64_s16 = int_to_ptr.hbm [resolvable:$true] %s63_s16 }
   0x4   :  { %s35_s13 = sshll.u32 %s671_s12, 4  ;;  %s672_s17 = smov 64   ;;  %s36_s13 = int_to_ptr.vmem [resolvable:$true] %s35_s13 }
   0x5   :  { %s673_s18 = smov 4   ;;  %s674_s19 = smov [#allocation8]  }
   0x6   :  { %41 = dma.hbm_to_vmem [thread:$0]  %s34_s11, 1024, %s36_s13, [#allocation6], %s672_s17, %s672_s17, %s673_s18  }
   0x7   :  { %s65_s20 = sshll.u32 %s674_s19, 4  ;;  %s23_s23 = sshll.u32 %s759_s0, 4  ;;  %s66_s20 = int_to_ptr.vmem [resolvable:$true] %s65_s20  ;;  %s24_s23 = int_to_ptr.hbm [resolvable:$true] %s23_s23 }
   0x8   :  { %71 = dma.hbm_to_vmem [thread:$0]  %s64_s16, 1024, %s66_s20, [#allocation9], %s672_s17, %s672_s17, %s673_s18  }
   0x9   :  { %s48_s25 = sshll.u32 %s762_s3, 4  ;;  %s675_s26 = smov [#allocation2]   ;;  %s49_s25 = int_to_ptr.hbm [resolvable:$true] %s48_s25 }
   0xa   :  { %s25_s27 = sshll.u32 %s675_s26, 4  ;;  %s676_s5 = smov [#allocation7]   ;;  %s26_s27 = int_to_ptr.vmem [resolvable:$true] %s25_s27 }
   0xb   :  { %28 = dma.hbm_to_vmem [thread:$0]  %s24_s23, 128, %s26_s27, [#allocation3]  }
   0xc   :  { %s50_s28 = sshll.u32 %s676_s5, 4  ;;  %s81_s10 = sshll.u32 %s767_s8, 4  ;;  %s51_s28 = int_to_ptr.vmem [resolvable:$true] %s50_s28  ;;  %s82_s10 = int_to_ptr.hbm [resolvable:$true] %s81_s10 }
   0xd   :  { %56 = dma.hbm_to_vmem [thread:$0]  %s49_s25, 1024, %s51_s28, [#allocation6], %s672_s17, %s672_s17, %s673_s18  }
   0xe   :  { %s677_s0 = smov [#allocation10]  }
   0xf   :  { %s83_s11 = sshll.u32 %s677_s0, 4  ;;  %s84_s11 = int_to_ptr.vmem [resolvable:$true] %s83_s11 }
  0x10   :  { %86 = dma.hbm_to_vmem [thread:$0]  %s82_s10, 128, %s84_s11, [#allocation9]  }
  0x11   :  { %663 = dma.done.wait [#allocation3], 128  }
  0x12   :  { %664 = vsyncadd [#allocation3], 4294967168 }
  0x13   :  { %665 = dma.done.wait [#allocation6], 2048  }
  0x14   :  { %666 = vsyncadd [#allocation6], 4294965248 }
  0x15   :  { %667 = dma.done.wait [#allocation9], 1152  }
  0x16   :  { %668 = vsyncadd [#allocation9], 4294966144  ;;  %v489_v0 = vld [vmem:[#allocation5 + $0x38] sm:$0xff]  ;;  %v488_v1 = vld [vmem:[#allocation5 + $0x30] sm:$0xff]  ;;  %s374_s20 = sshll.u32 %s768_s9, 4  ;;  %s375_s20 = int_to_ptr.hbm [resolvable:$true] %s374_s20 }
  0x17   :  { %177 = vmatpush.bf16.msra.mxu0 %v489_v0  ;;  %v497_v2 = vld [vmem:[#allocation7 + $0x38] sm:$0xff]  ;;  %v496_v3 = vld [vmem:[#allocation7 + $0x30] sm:$0xff]  ;;  %v487_v4 = vld [vmem:[#allocation5 + $0x28] sm:$0xff] }
  0x18   :  { %260 = vmatpush.bf16.msra.mxu1 %v497_v2  ;;  %v495_v5 = vld [vmem:[#allocation7 + $0x28] sm:$0xff]  ;;  %v486_v6 = vld [vmem:[#allocation5 + $0x20] sm:$0xff]  ;;  %v485_v8 = vld [vmem:[#allocation5 + $0x18] sm:$0xff] }
  0x19   :  { %v494_v7 = vld [vmem:[#allocation7 + $0x20] sm:$0xff]  ;;  %v493_v9 = vld [vmem:[#allocation7 + $0x18] sm:$0xff]  ;;  %v484_v10 = vld [vmem:[#allocation5 + $0x10] sm:$0xff] }
  0x1a   :  { %v492_v11 = vld [vmem:[#allocation7 + $0x10] sm:$0xff]  ;;  %v483_v12 = vld [vmem:[#allocation5 + $0x8] sm:$0xff]  ;;  %v482_v13 = vld [vmem:[#allocation5] sm:$0xff] }
  0x1b   :  { %178 = vmatpush.bf16.msra.mxu0 %v488_v1  ;;  %v107_v14 = vld [vmem:[#allocation2] sm:$0xff]  ;;  %v491_v16 = vld [vmem:[#allocation7 + $0x8] sm:$0xff]  ;;  %v490_v17 = vld [vmem:[#allocation7] sm:$0xff] }
  0x1c   :  { %261 = vmatpush.bf16.msra.mxu1 %v496_v3  ;;  %v108_v15 = vpack.c.bf16 %v107_v14, %v107_v14  ;;  %v505_v18 = vld [vmem:[#allocation8 + $0x38] sm:$0xff]  ;;  %v504_v19 = vld [vmem:[#allocation8 + $0x30] sm:$0xff]  ;;  %v503_v20 = vld [vmem:[#allocation8 + $0x28] sm:$0xff] }
  0x1d   :  { %343 = vmatpush.bf16.msra.mxu2 %v505_v18  ;;  %v502_v21 = vld [vmem:[#allocation8 + $0x20] sm:$0xff]  ;;  %v501_v22 = vld [vmem:[#allocation8 + $0x18] sm:$0xff]  ;;  %v500_v23 = vld [vmem:[#allocation8 + $0x10] sm:$0xff] }
  0x1e   :  { %v514_v24 = vld [vmem:[%s761_s2] ss:$0 sm:$0xff]  ;;  %v499_v30 = vld [vmem:[#allocation8 + $0x8] sm:$0xff]  ;;  %v498_v31 = vld [vmem:[#allocation8] sm:$0xff] }
  0x1f   :  { %179 = vmatpush.bf16.msra.mxu0 %v487_v4  ;;  %v515_v32 = vld [vmem:[%s763_s4] ss:$0 sm:$0xff]  ;;  %v360_v43 = vld [vmem:[#allocation10] sm:$0xff]  ;;  %s678_s4 = smov [#allocation11]  }
  0x20   :  { %262 = vmatpush.bf16.msra.mxu1 %v495_v5  ;;  %v356_v38 = vld [vmem:[%s766_s7] sm:$0x1]  ;;  %s372_s17 = sshll.u32 %s678_s4, 4  ;;  %s373_s17 = int_to_ptr.vmem [resolvable:$true] %s372_s17 }
  0x21   :  { %344 = vmatpush.bf16.msra.mxu2 %v504_v19  ;;  %v357_v39 = vmax.f32 %v356_v38, -13.815511  ;;  %v516_v44 = vld [vmem:[%s765_s6] ss:$0 sm:$0xff] }
  0x23   :  { %180 = vmatpush.bf16.msra.mxu0 %v486_v6  ;;  %v358_v40 = vmul.f32 1.442695, %v357_v39 }
  0x24   :  { %263 = vmatpush.bf16.msra.mxu1 %v494_v7 }
  0x25   :  { %345 = vmatpush.bf16.msra.mxu2 %v503_v20  ;;  %517 = vpow2.f32 %v358_v40 }
  0x27   :  { %181 = vmatpush.bf16.msra.mxu0 %v485_v8 }
  0x28   :  { %264 = vmatpush.bf16.msra.mxu1 %v493_v9 }
  0x29   :  { %346 = vmatpush.bf16.msra.mxu2 %v502_v21 }
  0x2b   :  { %182 = vmatpush.bf16.msra.mxu0 %v484_v10  ;;  %v518_v41 = vpop.eup %517 }
  0x2c   :  { %265 = vmatpush.bf16.msra.mxu1 %v492_v11  ;;  %v362_v42 = vperm.slane %v518_v41, 0 }
  0x2d   :  { %347 = vmatpush.bf16.msra.mxu2 %v501_v22 }
  0x2e   :  { %v364_v45 = vmul.f32 %v362_v42, %v360_v43 }
  0x2f   :  { %183 = vmatpush.bf16.msra.mxu0 %v483_v12 }
  0x30   :  { %266 = vmatpush.bf16.msra.mxu1 %v491_v16 }
  0x31   :  { %348 = vmatpush.bf16.msra.mxu2 %v500_v23 }
  0x33   :  { %184 = vmatpush.bf16.msra.mxu0 %v482_v13 }
  0x34   :  { %267 = vmatpush.bf16.msra.mxu1 %v490_v17 }
  0x35   :  { %349 = vmatpush.bf16.msra.mxu2 %v499_v30 }
  0x36   :  { %185 = vmatmul.bf16.vlgmr.msra.gmra.mxu0 %v108_v15 }
  0x39   :  { %350 = vmatpush.bf16.msra.mxu2 %v498_v31 }
  0xb3   :  { %v186_v25 = vpop.f32.mrf.mxu0 }
  0xb4   :  { %v187_v26 = vadd.f32 %v514_v24, %v186_v25 }
  0xb6   :  { %v190_v27 = vmax.f32 %v187_v26, 0.0 }
  0xb8   :  { %v191_v28 = vpack.c.bf16 %v190_v27, %v190_v27 }
  0xba   :  { %268 = vmatmul.bf16.vlgmr.msra.gmra.mxu1 %v191_v28 }
  0xbb   :  { %v188_v29 = vpop.f32.mrf.mxu0 }
 0x137   :  { %v269_v33 = vpop.f32.mrf.mxu1 }
 0x138   :  { %v270_v34 = vadd.f32 %v515_v32, %v269_v33 }
 0x13a   :  { %v273_v35 = vmax.f32 %v270_v34, 0.0 }
 0x13c   :  { %v274_v36 = vpack.c.bf16 %v273_v35, %v273_v35 }
 0x13e   :  { %351 = vmatmul.bf16.vlgmr.msra.gmra.mxu2 %v274_v36 }
 0x13f   :  { %v271_v37 = vpop.f32.mrf.mxu1 }
 0x1c1   :  { %v352_v46 = vpop.f32.mrf.mxu2 }
 0x1c2   :  { %v353_v47 = vadd.f32 %v516_v44, %v352_v46 }
 0x1c4   :  { %v365_v48 = vadd.f32 %v364_v45, %v353_v47 }
 0x1c6   :  { %366 = vst [vmem:[#allocation11] sm:$0xff] %v365_v48 }
 0x1c7   :  { %377 = dma.vmem_to_hbm [thread:$0]  %s373_s17, 128, %s375_s20, [#allocation4]  }
 0x1c9   :  { %v354_v49 = vpop.f32.mrf.mxu2 }
 0x1ca   :  { %669 = dma.done.wait [#allocation4], 128  }
 0x1cb   :  { %670 = vsyncadd [#allocation4], 4294967168 }
 0x1cc   :  { %382 = vsyncpa [#allocation3], 1 }
 0x1cd   :  { %383 = vsyncpa [#allocation6], 1 }
 0x1ce   :  { %384 = vsyncpa [#allocation9], 1 }
 0x1cf   :  { %385 = vsyncpa [#allocation4], 1 }

</bundles_post_ra>
